<compile_context>
chip_gen: v7x
topology: tpu7x:2x2x1
jax: 0.10.0
libtpu: 0.0.40
codegen_flags: <defaults>
</compile_context>

<pallas_src>
import math

import jax
import jax.numpy as jnp
import numpy as np
from jax import lax
from jax.experimental import pallas as pl
from jax.experimental.pallas import tpu as pltpu

EPSILON = 1e-4   # self.epsilon
HELPER = 2.5     # self.helper_tensor


def _make_kernel(num_layers, dist_dtype):
    """Kernel closure for a fixed (static) number of linear layers."""

    def kernel(*refs):
        # refs: x, (w0, b0, ..., w_{L-1}, b_{L-1}), boundaries, dist_out, val_out
        x_ref = refs[0]
        layer_refs = refs[1:1 + 2 * num_layers]
        bnd_ref = refs[1 + 2 * num_layers]       # [4, D] f32
        dist_ref = refs[2 + 2 * num_layers]      # [5, bm, D] int8
        val_ref = refs[3 + 2 * num_layers]       # [bm, D] f32

        x = x_ref[...]                           # [bm, D] f32

        # h = F.normalize(input): row-wise L2.  One EUP rsqrt + one multiply.
        sumsq = jnp.sum(x * x, axis=1, keepdims=True)
        h = x * lax.rsqrt(jnp.maximum(sumsq, 1e-24))

        # MLP autoencoder: Linear -> ReLU ... -> Linear -> Tanh (fully
        # unrolled).  Matmul operands in bf16 (MXU-native on all gens),
        # f32 accumulation; elementwise stays f32.
        for i in range(num_layers):
            w = layer_refs[2 * i][...]           # [d_in, d_out] bf16 (pre-T)
            b = layer_refs[2 * i + 1][...]       # [1, d_out] f32
            h = jnp.dot(h.astype(jnp.bfloat16), w,
                        preferred_element_type=jnp.float32) + b
            if i != num_layers - 1:
                h = jnp.maximum(h, 0.0)          # ReLU
            else:
                h = jnp.tanh(h)                  # Tanh

        fake = h * HELPER + HELPER               # fake_tensor, [bm, D]

        # project(): boundaries strictly increasing (relu(len)+eps > 0), so
        # the 4-factor Heaviside product equals the adjacent-boundary test
        # p_r = (fake > b_{r-1}) & (fake < b_r)  (b_{-1}=-inf, b_4=+inf).
        # Ties (fake == b_k) give 0 for both neighbouring ratings, matching
        # the original Heaviside (x <= 0 -> 0) semantics.
        bnd = bnd_ref[...]                       # [4, D]
        gt0 = fake > bnd[0:1, :]
        gt1 = fake > bnd[1:2, :]
        gt2 = fake > bnd[2:3, :]
        gt3 = fake > bnd[3:4, :]
        lt0 = fake < bnd[0:1, :]
        lt1 = fake < bnd[1:2, :]
        lt2 = fake < bnd[2:3, :]
        lt3 = fake < bnd[3:4, :]

        planes = (lt0, gt0 & lt1, gt1 & lt2, gt2 & lt3, gt3)

        # Per-plane direct int8 stores; expected rating value accumulated
        # alongside in f32 so stores overlap the next plane's math.
        val = jnp.zeros_like(fake)
        for r, p in enumerate(planes):
            dist_ref[r, :, :] = p.astype(dist_dtype)
            val = val + (r + 1.0) * p.astype(jnp.float32)

        # sampled_filler = input > 0 ; return value masked by filler.
        val_ref[...] = jnp.where(x > 0.0, val, 0.0)

    return kernel


def discret_generator_ae_1(x, weights, biases, min_boundary_value,
                           interval_lengths, *, block_b=None,
                           dist_dtype=jnp.int8, torch_layout=False):
    """JAX wrapper reproducing DiscretGenerator_AE_1.forward.

    Returns (fake_dsct_distribution, masked fake_dsct_value).  By default the
    distribution is the kernel-native, lane-dense [5, B, D] in `dist_dtype`
    (int8, values exactly 0/1).  With `torch_layout=True` it is transposed to
    the PyTorch [B, D, 5] f32 layout (lane-sparse, extra HBM traffic).
    """
    x = jnp.asarray(x, jnp.float32)
    B, D = x.shape
    num_layers = len(weights)

    # Glue: pre-transpose PyTorch [d_out, d_in] -> [d_in, d_out]; weights to
    # bf16 (MXU operands), biases stay f32 2-D.
    wt = [jnp.asarray(w, jnp.float32).T.astype(jnp.bfloat16) for w in weights]
    bs = [jnp.asarray(b, jnp.float32).reshape(1, -1) for b in biases]

    # get_boundary_values() is independent of x: precompute the 4 rows once.
    minb = jnp.asarray(min_boundary_value, jnp.float32).reshape(1, D)
    ilen = jnp.asarray(interval_lengths, jnp.float32)            # [D, 3]
    rows = [minb]
    for k in range(3):
        rows.append(rows[-1] + jnp.maximum(ilen[:, k].reshape(1, D), 0.0)
                    + EPSILON)
    boundaries = jnp.concatenate(rows, axis=0)                   # [4, D]

    if block_b is None:
        # Prefer large, 32-aligned batch tiles with >= 2 grid steps (v7x has
        # 2 TensorCores; a single grid step serializes onto one).
        block_b = B
        for cand in (512, 256, 128, 64, 32):
            if B % cand == 0 and B // cand >= 2:
                block_b = cand
                break
    assert B % block_b == 0, "batch must be divisible by block_b"
    # int8 dist tile packs 32 rows per sublane-tile: keep batch tiles aligned.
    assert block_b == B or block_b % 32 == 0, "block_b must be 32-aligned"
    grid = (B // block_b,)

    const = pl.Buffered(1)   # grid-invariant operands: single VMEM buffer

    args = [x]
    in_specs = [pl.BlockSpec((block_b, D), lambda i: (i, 0))]
    for w, b in zip(wt, bs):
        args += [w, b]
        in_specs += [pl.BlockSpec(w.shape, lambda i: (0, 0),
                                  pipeline_mode=const),
                     pl.BlockSpec(b.shape, lambda i: (0, 0),
                                  pipeline_mode=const)]
    args.append(boundaries)
    in_specs.append(pl.BlockSpec((4, D), lambda i: (0, 0),
                                 pipeline_mode=const))

    out_shape = (jax.ShapeDtypeStruct((5, B, D), dist_dtype),
                 jax.ShapeDtypeStruct((B, D), jnp.float32))
    out_specs = (pl.BlockSpec((5, block_b, D), lambda i: (0, i, 0)),
                 pl.BlockSpec((block_b, D), lambda i: (i, 0)))

    # Explicit VMEM budget (double-buffered x/outputs, single-buffered params)
    # so large tiles don't trip the default 16/32 MiB scoped limit.
    item = jnp.dtype(dist_dtype).itemsize
    need = (2 * block_b * D * 4                       # x
            + 2 * 5 * block_b * D * item              # dist planes
            + 2 * block_b * D * 4                     # val
            + sum(int(np.prod(w.shape)) * 2 for w in wt)
            + sum(int(np.prod(b.shape)) * 4 for b in bs)
            + 4 * D * 4)                              # boundaries
    vmem_limit = int(min(max(32 << 20, need + (4 << 20)), 120 << 20))

    dist_5bd, val = pl.pallas_call(
        _make_kernel(num_layers, dist_dtype),
        grid=grid,
        out_shape=out_shape,
        in_specs=in_specs,
        out_specs=out_specs,
        compiler_params=pltpu.CompilerParams(
            dimension_semantics=("parallel",),
            vmem_limit_bytes=vmem_limit),
    )(*args)

    if torch_layout:
        # PyTorch parity layout [B, D, 5] f32 — lane-sparse; opt-in only.
        return jnp.transpose(dist_5bd.astype(jnp.float32), (1, 2, 0)), val
    return dist_5bd, val


def _reference(x, weights, biases, min_boundary_value, interval_lengths,
               *, bf16_matmul=False):
    """Pure-JAX reference of the original PyTorch forward (for checking).

    Returns dist in the kernel-native [5, B, D] layout.  `bf16_matmul=True`
    mimics the kernel's bf16-operand / f32-accumulate matmuls.
    """
    x = jnp.asarray(x, jnp.float32)
    sumsq = jnp.sum(x * x, axis=1, keepdims=True)
    h = x * lax.rsqrt(jnp.maximum(sumsq, 1e-24))
    for i, (w, b) in enumerate(zip(weights, biases)):
        wt = jnp.asarray(w, jnp.float32).T
        if bf16_matmul:
            h = jnp.dot(h.astype(jnp.bfloat16), wt.astype(jnp.bfloat16),
                        preferred_element_type=jnp.float32)
        else:
            h = jnp.dot(h, wt, precision=lax.Precision.HIGHEST)
        h = h + jnp.asarray(b, jnp.float32)
        h = jnp.maximum(h, 0.0) if i != len(weights) - 1 else jnp.tanh(h)
    fake = h * HELPER + HELPER
    bnds = [jnp.asarray(min_boundary_value, jnp.float32)]
    ilen = jnp.asarray(interval_lengths, jnp.float32)
    for k in range(3):
        bnds.append(bnds[-1] + jnp.maximum(ilen[:, k], 0.0) + EPSILON)
    probs = []
    for r in range(5):
        p = jnp.ones_like(fake)
        for k in range(4):
            sgn = 1.0 if (r - k - 0.5) > 0 else -1.0
            p = p * (sgn * (fake - bnds[k][None, :]) > 0).astype(jnp.float32)
        probs.append(p)
    dist = jnp.stack(probs, axis=0)                              # [5, B, D]
    val = jnp.einsum("rbd,r->bd", dist,
                     jnp.arange(1.0, 6.0, dtype=jnp.float32))
    return dist, val * (x > 0.0)


if __name__ == "__main__":
    # Shapes consistent with the module: autoencoder p_dims = [32, 16, 8]
    # => layer dims [32, 16, 8, 16, 32]; batch B = 64 (so the default tiling
    # picks block_b = 32 -> 2 grid steps), input_dim D = 32.
    B = 64
    p_dims = [32, 16, 8]
    dims = p_dims + p_dims[::-1][1:]     # [32, 16, 8, 16, 32]
    D = p_dims[0]

    key = jax.random.PRNGKey(0)
    key, xk = jax.random.split(key)
    # Integer-ish ratings in [0, 5]; zeros occur so the >0 mask is exercised.
    x = jnp.round(5.0 * jax.random.uniform(xk, (B, D), dtype=jnp.float32))

    # init_weights(): weight ~ N(0, sqrt(2/(fan_in+fan_out))), bias ~ N(0, 1e-3)
    weights, biases = [], []
    for d_in, d_out in zip(dims[:-1], dims[1:]):
        key, wk, bk = jax.random.split(key, 3)
        std = math.sqrt(2.0 / (d_in + d_out))
        weights.append(std * jax.random.normal(wk, (d_out, d_in),
                                               dtype=jnp.float32))
        biases.append(0.001 * jax.random.normal(bk, (d_out,),
                                                dtype=jnp.float32))

    # BaseDiscretGenerator_1 parameters (as initialized in __init__: ones)
    min_boundary_value = jnp.ones((D,), dtype=jnp.float32)
    interval_lengths = jnp.ones((D, 3), dtype=jnp.float32)

    dist, val = discret_generator_ae_1(
        x, weights, biases, min_boundary_value, interval_lengths)
    jax.block_until_ready((dist, val))

    assert dist.shape == (5, B, D) and dist.dtype == jnp.int8
    assert val.shape == (B, D)

    # Exact internal-consistency checks on the kernel outputs.
    d_np = np.asarray(dist).astype(np.float32)
    v_np = np.asarray(val)
    x_np = np.asarray(x)
    assert np.all((d_np == 0.0) | (d_np == 1.0))
    recon = np.einsum("rbd,r->bd", d_np, np.arange(1.0, 6.0, dtype=np.float32))
    assert np.array_equal(v_np, recon * (x_np > 0.0))

    # Matched-precision reference (bf16 matmul operands, f32 accumulation):
    # discrete outputs can flip only for fake values within rounding of a
    # boundary — allow <1%.
    dist_m, val_m = _reference(x, weights, biases, min_boundary_value,
                               interval_lengths, bf16_matmul=True)
    dist_mismatch = np.mean(np.asarray(dist_m) != d_np)
    val_mismatch = np.mean(~np.isclose(np.asarray(val_m), v_np, atol=1e-5))
    assert dist_mismatch < 0.01, dist_mismatch
    assert val_mismatch < 0.01, val_mismatch

    # Full-f32 (PyTorch-faithful) reference: bf16 weight quantization may flip
    # a few boundary-adjacent ratings — allow a looser <5%.
    dist_f, _ = _reference(x, weights, biases, min_boundary_value,
                           interval_lengths, bf16_matmul=False)
    f32_mismatch = np.mean(np.asarray(dist_f) != d_np)
    assert f32_mismatch < 0.05, f32_mismatch

    print("KERNEL_OK")
</pallas_src>

<mosaic_0001>
module attributes {stable_mosaic.version = 11 : i64} {
  func.func @kernel(%arg0: i32, %arg1: memref<32x32xf32, #tpu.memory_space<vmem>>, %arg2: memref<32x16xbf16, #tpu.memory_space<vmem>>, %arg3: memref<1x16xf32, #tpu.memory_space<vmem>>, %arg4: memref<16x8xbf16, #tpu.memory_space<vmem>>, %arg5: memref<1x8xf32, #tpu.memory_space<vmem>>, %arg6: memref<8x16xbf16, #tpu.memory_space<vmem>>, %arg7: memref<1x16xf32, #tpu.memory_space<vmem>>, %arg8: memref<16x32xbf16, #tpu.memory_space<vmem>>, %arg9: memref<1x32xf32, #tpu.memory_space<vmem>>, %arg10: memref<4x32xf32, #tpu.memory_space<vmem>>, %arg11: memref<5x32x32xi8, #tpu.memory_space<vmem>>, %arg12: memref<32x32xf32, #tpu.memory_space<vmem>>) attributes {dimension_semantics = [#tpu.dimension_semantics<parallel>], iteration_bounds = array<i64: 2>, scalar_prefetch = 0 : i64, scratch_operands = 0 : i64, tpu.core_type = #tpu.core_type<tc>, window_params = [{transform_indices = @transform_0, window_bounds = array<i64: 32, 32>}, {pipeline_mode = #tpu.pipeline_mode<synchronous>, transform_indices = @transform_1, window_bounds = array<i64: 32, 16>}, {pipeline_mode = #tpu.pipeline_mode<synchronous>, transform_indices = @transform_2, window_bounds = array<i64: 1, 16>}, {pipeline_mode = #tpu.pipeline_mode<synchronous>, transform_indices = @transform_3, window_bounds = array<i64: 16, 8>}, {pipeline_mode = #tpu.pipeline_mode<synchronous>, transform_indices = @transform_4, window_bounds = array<i64: 1, 8>}, {pipeline_mode = #tpu.pipeline_mode<synchronous>, transform_indices = @transform_5, window_bounds = array<i64: 8, 16>}, {pipeline_mode = #tpu.pipeline_mode<synchronous>, transform_indices = @transform_6, window_bounds = array<i64: 1, 16>}, {pipeline_mode = #tpu.pipeline_mode<synchronous>, transform_indices = @transform_7, window_bounds = array<i64: 16, 32>}, {pipeline_mode = #tpu.pipeline_mode<synchronous>, transform_indices = @transform_8, window_bounds = array<i64: 1, 32>}, {pipeline_mode = #tpu.pipeline_mode<synchronous>, transform_indices = @transform_9, window_bounds = array<i64: 4, 32>}, {transform_indices = @transform_10, window_bounds = array<i64: 5, 32, 32>}, {transform_indices = @transform_11, window_bounds = array<i64: 32, 32>}]} {
    %c0 = arith.constant 0 : index
    %c0_0 = arith.constant 0 : index
    %0 = vector.load %arg1[%c0, %c0_0] : memref<32x32xf32, #tpu.memory_space<vmem>>, vector<32x32xf32>
    %1 = arith.mulf %0, %0 : vector<32x32xf32>
    %cst = arith.constant dense<0.000000e+00> : vector<32xf32>
    %2 = vector.multi_reduction <add>, %1, %cst [1] : vector<32x32xf32> to vector<32xf32>
    %3 = vector.shape_cast %2 : vector<32xf32> to vector<32x1xf32>
    %cst_1 = arith.constant 1.000000e-24 : f32
    %4 = vector.broadcast %cst_1 : f32 to vector<32x1xf32>
    %5 = arith.maximumf %3, %4 : vector<32x1xf32>
    %6 = math.rsqrt %5 : vector<32x1xf32>
    %7 = vector.broadcast %6 : vector<32x1xf32> to vector<32x32xf32>
    %8 = arith.mulf %0, %7 : vector<32x32xf32>
    %c0_2 = arith.constant 0 : index
    %c0_3 = arith.constant 0 : index
    %9 = vector.load %arg2[%c0_2, %c0_3] : memref<32x16xbf16, #tpu.memory_space<vmem>>, vector<32x16xbf16>
    %c0_4 = arith.constant 0 : index
    %c0_5 = arith.constant 0 : index
    %10 = vector.load %arg3[%c0_4, %c0_5] : memref<1x16xf32, #tpu.memory_space<vmem>>, vector<1x16xf32>
    %11 = arith.truncf %8 : vector<32x32xf32> to vector<32x32xbf16>
    %cst_6 = arith.constant dense<0.000000e+00> : vector<32x16xf32>
    %12 = tpu.matmul %11, %9, %cst_6 {dimension_numbers = #tpu.dot_dimension_numbers<[1], [0], [0], [1], [0, 0, 1, 1], [], []>} : vector<32x32xbf16>, vector<32x16xbf16>, vector<32x16xf32> -> vector<32x16xf32>
    %13 = vector.broadcast %10 : vector<1x16xf32> to vector<32x16xf32>
    %14 = arith.addf %12, %13 : vector<32x16xf32>
    %cst_7 = arith.constant 0.000000e+00 : f32
    %15 = vector.broadcast %cst_7 : f32 to vector<32x16xf32>
    %16 = arith.maximumf %14, %15 : vector<32x16xf32>
    %c0_8 = arith.constant 0 : index
    %c0_9 = arith.constant 0 : index
    %17 = vector.load %arg4[%c0_8, %c0_9] : memref<16x8xbf16, #tpu.memory_space<vmem>>, vector<16x8xbf16>
    %c0_10 = arith.constant 0 : index
    %c0_11 = arith.constant 0 : index
    %18 = vector.load %arg5[%c0_10, %c0_11] : memref<1x8xf32, #tpu.memory_space<vmem>>, vector<1x8xf32>
    %19 = arith.truncf %16 : vector<32x16xf32> to vector<32x16xbf16>
    %cst_12 = arith.constant dense<0.000000e+00> : vector<32x8xf32>
    %20 = tpu.matmul %19, %17, %cst_12 {dimension_numbers = #tpu.dot_dimension_numbers<[1], [0], [0], [1], [0, 0, 1, 1], [], []>} : vector<32x16xbf16>, vector<16x8xbf16>, vector<32x8xf32> -> vector<32x8xf32>
    %21 = vector.broadcast %18 : vector<1x8xf32> to vector<32x8xf32>
    %22 = arith.addf %20, %21 : vector<32x8xf32>
    %cst_13 = arith.constant 0.000000e+00 : f32
    %23 = vector.broadcast %cst_13 : f32 to vector<32x8xf32>
    %24 = arith.maximumf %22, %23 : vector<32x8xf32>
    %c0_14 = arith.constant 0 : index
    %c0_15 = arith.constant 0 : index
    %25 = vector.load %arg6[%c0_14, %c0_15] : memref<8x16xbf16, #tpu.memory_space<vmem>>, vector<8x16xbf16>
    %c0_16 = arith.constant 0 : index
    %c0_17 = arith.constant 0 : index
    %26 = vector.load %arg7[%c0_16, %c0_17] : memref<1x16xf32, #tpu.memory_space<vmem>>, vector<1x16xf32>
    %27 = arith.truncf %24 : vector<32x8xf32> to vector<32x8xbf16>
    %cst_18 = arith.constant dense<0.000000e+00> : vector<32x16xf32>
    %28 = tpu.matmul %27, %25, %cst_18 {dimension_numbers = #tpu.dot_dimension_numbers<[1], [0], [0], [1], [0, 0, 1, 1], [], []>} : vector<32x8xbf16>, vector<8x16xbf16>, vector<32x16xf32> -> vector<32x16xf32>
    %29 = vector.broadcast %26 : vector<1x16xf32> to vector<32x16xf32>
    %30 = arith.addf %28, %29 : vector<32x16xf32>
    %cst_19 = arith.constant 0.000000e+00 : f32
    %31 = vector.broadcast %cst_19 : f32 to vector<32x16xf32>
    %32 = arith.maximumf %30, %31 : vector<32x16xf32>
    %c0_20 = arith.constant 0 : index
    %c0_21 = arith.constant 0 : index
    %33 = vector.load %arg8[%c0_20, %c0_21] : memref<16x32xbf16, #tpu.memory_space<vmem>>, vector<16x32xbf16>
    %c0_22 = arith.constant 0 : index
    %c0_23 = arith.constant 0 : index
    %34 = vector.load %arg9[%c0_22, %c0_23] : memref<1x32xf32, #tpu.memory_space<vmem>>, vector<1x32xf32>
    %35 = arith.truncf %32 : vector<32x16xf32> to vector<32x16xbf16>
    %cst_24 = arith.constant dense<0.000000e+00> : vector<32x32xf32>
    %36 = tpu.matmul %35, %33, %cst_24 {dimension_numbers = #tpu.dot_dimension_numbers<[1], [0], [0], [1], [0, 0, 1, 1], [], []>} : vector<32x16xbf16>, vector<16x32xbf16>, vector<32x32xf32> -> vector<32x32xf32>
    %37 = vector.broadcast %34 : vector<1x32xf32> to vector<32x32xf32>
    %38 = arith.addf %36, %37 : vector<32x32xf32>
    %39 = math.tanh %38 : vector<32x32xf32>
    %cst_25 = arith.constant 2.500000e+00 : f32
    %40 = vector.broadcast %cst_25 : f32 to vector<32x32xf32>
    %41 = arith.mulf %39, %40 : vector<32x32xf32>
    %cst_26 = arith.constant 2.500000e+00 : f32
    %42 = vector.broadcast %cst_26 : f32 to vector<32x32xf32>
    %43 = arith.addf %41, %42 : vector<32x32xf32>
    %c0_27 = arith.constant 0 : index
    %c0_28 = arith.constant 0 : index
    %44 = vector.load %arg10[%c0_27, %c0_28] : memref<4x32xf32, #tpu.memory_space<vmem>>, vector<4x32xf32>
    %45 = vector.extract_strided_slice %44 {offsets = [0, 0], sizes = [1, 32], strides = [1, 1]} : vector<4x32xf32> to vector<1x32xf32>
    %46 = vector.broadcast %45 : vector<1x32xf32> to vector<32x32xf32>
    %47 = arith.cmpf ogt, %43, %46 : vector<32x32xf32>
    %48 = vector.extract_strided_slice %44 {offsets = [1, 0], sizes = [1, 32], strides = [1, 1]} : vector<4x32xf32> to vector<1x32xf32>
    %49 = vector.broadcast %48 : vector<1x32xf32> to vector<32x32xf32>
    %50 = arith.cmpf ogt, %43, %49 : vector<32x32xf32>
    %51 = vector.extract_strided_slice %44 {offsets = [2, 0], sizes = [1, 32], strides = [1, 1]} : vector<4x32xf32> to vector<1x32xf32>
    %52 = vector.broadcast %51 : vector<1x32xf32> to vector<32x32xf32>
    %53 = arith.cmpf ogt, %43, %52 : vector<32x32xf32>
    %54 = vector.extract_strided_slice %44 {offsets = [3, 0], sizes = [1, 32], strides = [1, 1]} : vector<4x32xf32> to vector<1x32xf32>
    %55 = vector.broadcast %54 : vector<1x32xf32> to vector<32x32xf32>
    %56 = arith.cmpf ogt, %43, %55 : vector<32x32xf32>
    %57 = vector.extract_strided_slice %44 {offsets = [0, 0], sizes = [1, 32], strides = [1, 1]} : vector<4x32xf32> to vector<1x32xf32>
    %58 = vector.broadcast %57 : vector<1x32xf32> to vector<32x32xf32>
    %59 = arith.cmpf olt, %43, %58 : vector<32x32xf32>
    %60 = vector.extract_strided_slice %44 {offsets = [1, 0], sizes = [1, 32], strides = [1, 1]} : vector<4x32xf32> to vector<1x32xf32>
    %61 = vector.broadcast %60 : vector<1x32xf32> to vector<32x32xf32>
    %62 = arith.cmpf olt, %43, %61 : vector<32x32xf32>
    %63 = vector.extract_strided_slice %44 {offsets = [2, 0], sizes = [1, 32], strides = [1, 1]} : vector<4x32xf32> to vector<1x32xf32>
    %64 = vector.broadcast %63 : vector<1x32xf32> to vector<32x32xf32>
    %65 = arith.cmpf olt, %43, %64 : vector<32x32xf32>
    %66 = vector.extract_strided_slice %44 {offsets = [3, 0], sizes = [1, 32], strides = [1, 1]} : vector<4x32xf32> to vector<1x32xf32>
    %67 = vector.broadcast %66 : vector<1x32xf32> to vector<32x32xf32>
    %68 = arith.cmpf olt, %43, %67 : vector<32x32xf32>
    %69 = arith.andi %47, %62 : vector<32x32xi1>
    %70 = arith.andi %50, %65 : vector<32x32xi1>
    %71 = arith.andi %53, %68 : vector<32x32xi1>
    %cst_29 = arith.constant 0.000000e+00 : f32
    %72 = vector.broadcast %cst_29 : f32 to vector<32x32xf32>
    %73 = arith.extui %59 : vector<32x32xi1> to vector<32x32xi8>
    %c0_30 = arith.constant 0 : index
    %c0_31 = arith.constant 0 : index
    %c0_32 = arith.constant 0 : index
    %74 = vector.load %arg11[%c0_30, %c0_31, %c0_32] : memref<5x32x32xi8, #tpu.memory_space<vmem>>, vector<1x32x32xi8>
    %75 = vector.shape_cast %74 : vector<1x32x32xi8> to vector<32x32xi8>
    %76 = vector.shape_cast %73 : vector<32x32xi8> to vector<1x32x32xi8>
    tpu.vector_store %arg11[%c0_30, %c0_31, %c0_32], %76 {strides = array<i32>} : memref<5x32x32xi8, #tpu.memory_space<vmem>>, vector<1x32x32xi8>,
    %77 = arith.extui %59 : vector<32x32xi1> to vector<32x32xi32>
    %78 = arith.sitofp %77 : vector<32x32xi32> to vector<32x32xf32>
    %cst_33 = arith.constant 1.000000e+00 : f32
    %79 = vector.broadcast %cst_33 : f32 to vector<32x32xf32>
    %80 = arith.mulf %79, %78 : vector<32x32xf32>
    %81 = arith.addf %72, %80 : vector<32x32xf32>
    %82 = arith.extui %69 : vector<32x32xi1> to vector<32x32xi8>
    %c1 = arith.constant 1 : index
    %c0_34 = arith.constant 0 : index
    %c0_35 = arith.constant 0 : index
    %83 = vector.load %arg11[%c1, %c0_34, %c0_35] : memref<5x32x32xi8, #tpu.memory_space<vmem>>, vector<1x32x32xi8>
    %84 = vector.shape_cast %83 : vector<1x32x32xi8> to vector<32x32xi8>
    %85 = vector.shape_cast %82 : vector<32x32xi8> to vector<1x32x32xi8>
    tpu.vector_store %arg11[%c1, %c0_34, %c0_35], %85 {strides = array<i32>} : memref<5x32x32xi8, #tpu.memory_space<vmem>>, vector<1x32x32xi8>,
    %86 = arith.extui %69 : vector<32x32xi1> to vector<32x32xi32>
    %87 = arith.sitofp %86 : vector<32x32xi32> to vector<32x32xf32>
    %cst_36 = arith.constant 2.000000e+00 : f32
    %88 = vector.broadcast %cst_36 : f32 to vector<32x32xf32>
    %89 = arith.mulf %88, %87 : vector<32x32xf32>
    %90 = arith.addf %81, %89 : vector<32x32xf32>
    %91 = arith.extui %70 : vector<32x32xi1> to vector<32x32xi8>
    %c2 = arith.constant 2 : index
    %c0_37 = arith.constant 0 : index
    %c0_38 = arith.constant 0 : index
    %92 = vector.load %arg11[%c2, %c0_37, %c0_38] : memref<5x32x32xi8, #tpu.memory_space<vmem>>, vector<1x32x32xi8>
    %93 = vector.shape_cast %92 : vector<1x32x32xi8> to vector<32x32xi8>
    %94 = vector.shape_cast %91 : vector<32x32xi8> to vector<1x32x32xi8>
    tpu.vector_store %arg11[%c2, %c0_37, %c0_38], %94 {strides = array<i32>} : memref<5x32x32xi8, #tpu.memory_space<vmem>>, vector<1x32x32xi8>,
    %95 = arith.extui %70 : vector<32x32xi1> to vector<32x32xi32>
    %96 = arith.sitofp %95 : vector<32x32xi32> to vector<32x32xf32>
    %cst_39 = arith.constant 3.000000e+00 : f32
    %97 = vector.broadcast %cst_39 : f32 to vector<32x32xf32>
    %98 = arith.mulf %97, %96 : vector<32x32xf32>
    %99 = arith.addf %90, %98 : vector<32x32xf32>
    %100 = arith.extui %71 : vector<32x32xi1> to vector<32x32xi8>
    %c3 = arith.constant 3 : index
    %c0_40 = arith.constant 0 : index
    %c0_41 = arith.constant 0 : index
    %101 = vector.load %arg11[%c3, %c0_40, %c0_41] : memref<5x32x32xi8, #tpu.memory_space<vmem>>, vector<1x32x32xi8>
    %102 = vector.shape_cast %101 : vector<1x32x32xi8> to vector<32x32xi8>
    %103 = vector.shape_cast %100 : vector<32x32xi8> to vector<1x32x32xi8>
    tpu.vector_store %arg11[%c3, %c0_40, %c0_41], %103 {strides = array<i32>} : memref<5x32x32xi8, #tpu.memory_space<vmem>>, vector<1x32x32xi8>,
    %104 = arith.extui %71 : vector<32x32xi1> to vector<32x32xi32>
    %105 = arith.sitofp %104 : vector<32x32xi32> to vector<32x32xf32>
    %cst_42 = arith.constant 4.000000e+00 : f32
    %106 = vector.broadcast %cst_42 : f32 to vector<32x32xf32>
    %107 = arith.mulf %106, %105 : vector<32x32xf32>
    %108 = arith.addf %99, %107 : vector<32x32xf32>
    %109 = arith.extui %56 : vector<32x32xi1> to vector<32x32xi8>
    %c4 = arith.constant 4 : index
    %c0_43 = arith.constant 0 : index
    %c0_44 = arith.constant 0 : index
    %110 = vector.load %arg11[%c4, %c0_43, %c0_44] : memref<5x32x32xi8, #tpu.memory_space<vmem>>, vector<1x32x32xi8>
    %111 = vector.shape_cast %110 : vector<1x32x32xi8> to vector<32x32xi8>
    %112 = vector.shape_cast %109 : vector<32x32xi8> to vector<1x32x32xi8>
    tpu.vector_store %arg11[%c4, %c0_43, %c0_44], %112 {strides = array<i32>} : memref<5x32x32xi8, #tpu.memory_space<vmem>>, vector<1x32x32xi8>,
    %113 = arith.extui %56 : vector<32x32xi1> to vector<32x32xi32>
    %114 = arith.sitofp %113 : vector<32x32xi32> to vector<32x32xf32>
    %cst_45 = arith.constant 5.000000e+00 : f32
    %115 = vector.broadcast %cst_45 : f32 to vector<32x32xf32>
    %116 = arith.mulf %115, %114 : vector<32x32xf32>
    %117 = arith.addf %108, %116 : vector<32x32xf32>
    %cst_46 = arith.constant 0.000000e+00 : f32
    %118 = vector.broadcast %cst_46 : f32 to vector<32x32xf32>
    %119 = arith.cmpf ogt, %0, %118 : vector<32x32xf32>
    %cst_47 = arith.constant 0.000000e+00 : f32
    %120 = vector.broadcast %cst_47 : f32 to vector<32x32xf32>
    %121 = arith.select %119, %117, %120 : vector<32x32xi1>, vector<32x32xf32>
    %c0_48 = arith.constant 0 : index
    %c0_49 = arith.constant 0 : index
    %122 = vector.load %arg12[%c0_48, %c0_49] : memref<32x32xf32, #tpu.memory_space<vmem>>, vector<32x32xf32>
    tpu.vector_store %arg12[%c0_48, %c0_49], %121 {strides = array<i32>} : memref<32x32xf32, #tpu.memory_space<vmem>>, vector<32x32xf32>,
    return
  }
  func.func @transform_0(%arg0: i32) -> (i32, i32) {
    %c0_i32 = arith.constant 0 : i32
    %c0_i32_0 = arith.constant 0 : i32
    return %arg0, %c0_i32 : i32, i32
  }
  func.func @transform_1(%arg0: i32) -> (i32, i32) {
    %c0_i32 = arith.constant 0 : i32
    %c0_i32_0 = arith.constant 0 : i32
    %c0_i32_1 = arith.constant 0 : i32
    return %c0_i32, %c0_i32_0 : i32, i32
  }
  func.func @transform_2(%arg0: i32) -> (i32, i32) {
    %c0_i32 = arith.constant 0 : i32
    %c0_i32_0 = arith.constant 0 : i32
    %c0_i32_1 = arith.constant 0 : i32
    return %c0_i32, %c0_i32_0 : i32, i32
  }
  func.func @transform_3(%arg0: i32) -> (i32, i32) {
    %c0_i32 = arith.constant 0 : i32
    %c0_i32_0 = arith.constant 0 : i32
    %c0_i32_1 = arith.constant 0 : i32
    return %c0_i32, %c0_i32_0 : i32, i32
  }
  func.func @transform_4(%arg0: i32) -> (i32, i32) {
    %c0_i32 = arith.constant 0 : i32
    %c0_i32_0 = arith.constant 0 : i32
    %c0_i32_1 = arith.constant 0 : i32
    return %c0_i32, %c0_i32_0 : i32, i32
  }
  func.func @transform_5(%arg0: i32) -> (i32, i32) {
    %c0_i32 = arith.constant 0 : i32
    %c0_i32_0 = arith.constant 0 : i32
    %c0_i32_1 = arith.constant 0 : i32
    return %c0_i32, %c0_i32_0 : i32, i32
  }
  func.func @transform_6(%arg0: i32) -> (i32, i32) {
    %c0_i32 = arith.constant 0 : i32
    %c0_i32_0 = arith.constant 0 : i32
    %c0_i32_1 = arith.constant 0 : i32
    return %c0_i32, %c0_i32_0 : i32, i32
  }
  func.func @transform_7(%arg0: i32) -> (i32, i32) {
    %c0_i32 = arith.constant 0 : i32
    %c0_i32_0 = arith.constant 0 : i32
    %c0_i32_1 = arith.constant 0 : i32
    return %c0_i32, %c0_i32_0 : i32, i32
  }
  func.func @transform_8(%arg0: i32) -> (i32, i32) {
    %c0_i32 = arith.constant 0 : i32
    %c0_i32_0 = arith.constant 0 : i32
    %c0_i32_1 = arith.constant 0 : i32
    return %c0_i32, %c0_i32_0 : i32, i32
  }
  func.func @transform_9(%arg0: i32) -> (i32, i32) {
    %c0_i32 = arith.constant 0 : i32
    %c0_i32_0 = arith.constant 0 : i32
    %c0_i32_1 = arith.constant 0 : i32
    return %c0_i32, %c0_i32_0 : i32, i32
  }
  func.func @transform_10(%arg0: i32) -> (i32, i32, i32) {
    %c0_i32 = arith.constant 0 : i32
    %c0_i32_0 = arith.constant 0 : i32
    %c0_i32_1 = arith.constant 0 : i32
    return %c0_i32, %arg0, %c0_i32_0 : i32, i32, i32
  }
  func.func @transform_11(%arg0: i32) -> (i32, i32) {
    %c0_i32 = arith.constant 0 : i32
    %c0_i32_0 = arith.constant 0 : i32
    return %arg0, %c0_i32 : i32, i32
  }
}

</mosaic_0001>

<bundles_post_ra>
// kernel: tpu_custom_call.1
= control target key start
LH: loop header
LB: loop body
LE: loop exit
PB: predicated region body
PF: predicated region fallthrough
CT: control target
= control target key end

     0   :  { %s1296_s17 = smov 0   ;;  %s1298_s18 = smov 0   ;;  %s1738_s0 = inlined_call_operand.vmem [shape: f32[64,32], index: 0, kind: input, shape index: {}]   ;;  %s1739_s1 = inlined_call_operand.vmem [shape: bf16[32,16], index: 1, kind: input, shape index: {}]   ;;  %s1740_s2 = inlined_call_operand.vmem [shape: f32[1,16], index: 2, kind: input, shape index: {}]   ;;  %s1741_s3 = inlined_call_operand.vmem [shape: bf16[16,8], index: 3, kind: input, shape index: {}]   ;;  %s1742_s4 = inlined_call_operand.vmem [shape: f32[1,8], index: 4, kind: input, shape index: {}]   ;;  %s1743_s5 = inlined_call_operand.vmem [shape: bf16[8,16], index: 5, kind: input, shape index: {}]   ;;  %s1744_s6 = inlined_call_operand.vmem [shape: f32[1,16], index: 6, kind: input, shape index: {}]   ;;  %s1745_s7 = inlined_call_operand.vmem [shape: bf16[16,32], index: 7, kind: input, shape index: {}]   ;;  %s1746_s8 = inlined_call_operand.vmem [shape: f32[1,32], index: 8, kind: input, shape index: {}]   ;;  %s1747_s9 = inlined_call_operand.vmem [shape: f32[4,32], index: 9, kind: input, shape index: {}]   ;;  %s1748_s10 = inlined_call_operand.vmem [shape: s8[5,64,32], index: 10, kind: output, shape index: {0}]   ;;  %s1749_s11 = inlined_call_operand.vmem [shape: f32[64,32], index: 11, kind: output, shape index: {1}]  }
   0x1   :  { %s1300_s19 = smov 0  }
   0x2 LB: > { %s1309_s20 = sadd.s32 4294967295, %s1232_s19   ;;  %s1311_s21 = sadd.s32 1, %s1232_s19   ;;  %s1232_s19 = sphi %s1300_s19, %s1814_s19   ;;  %s1228_s18 = sphi %s1298_s18, %s1813_s18   ;;  %s1224_s17 = sphi %s1296_s17, %s1812_s17  }
   0x3   : > { %s241_s22 = ssub.s32 %s1232_s19, %s1311_s21  ;;  %s244_s23 = sadd.s32 1, %s1228_s18 }
   0x4   : > { %p242_p0 = scmp.eq.s32.totalorder %s241_s22, 0  ;;  %p254_p1 = scmp.ne.s32.totalorder %s1228_s18, %s1224_s17 }
   0x5   : > { %p255_p2 = scmp.eq.s32.totalorder %s1309_s20, 1  ;;  %p1075_p3 = scmp.ge.s32.totalorder %s1232_s19, 1 }
   0x6   : > { %s1319_s24 = scalar_select %p242_p0, %s1228_s18, %s244_s23  }
   0x7   : > { %p1321_p4 = por %p255_p2, %p254_p1  ;;  %p341_p5 = scmp.lt.s32.totalorder %s1232_s19, 3 }
   0x9   : > { %p342_p6 = pnand %p1075_p3, %p341_p5 }
   0xa   : > { %s1076_s26 = sshll.u32 (!%p342_p6), %s1309_s20, 2  ;;  %vm1752_vm0 = vcmask (!%p342_p6), 261120   ;;  %v1190_v12 = vld [vmem:[%s1739_s1] sm:$0xff] (!%p342_p6)   ;;  %v1191_v13 = vld [vmem:[%s1739_s1 + $0x8] sm:$0xff] (!%p342_p6)   ;;  %vm534_vm1 = vcmask (!%p342_p6), 130048   ;;  %vm611_vm2 = vcmask (!%p342_p6), 1043456  }
   0xb   : > { %345 = sbr.rel (%p342_p6) target bundleno = 1132 (0x46c), region = 60  ;;  %p386_p7 = scmp.lt.s32.totalorder (!%p342_p6), %s1076_s26, 7  ;;  %1136 = vmatprep.subr.bf16.mxu0 (!%p342_p6), %v1190_v12  ;;  %v1192_v32 = vld [vmem:[%s1741_s3] sm:$0xff] (!%p342_p6)   ;;  %vm604_vm3 = vcmask (!%p342_p6), 64512  }
   0xc   : > { %1137 = vmatpush3.bf16.msra.mxu0 (!%p342_p6), %v1190_v12  ;;  %1144 = vmatprep.subr.bf16.mxu1 (!%p342_p6), %v1192_v32  ;;  %v1080_v33 = vld [vmem:[%s1740_s2] ss:$0 sm:$0xff] (!%p342_p6) }
   0xd   : > { %1138 = vmatprep.subr.bf16.mxu0 (!%p342_p6), %v1191_v13  ;;  %1145 = vmatpush3.bf16.msra.mxu1 (!%p342_p6), %v1192_v32  ;;  %v594_v48 = vld [vmem:[%s1743_s5] sm:$0xf] (!%p342_p6) }
   0xe   : > { %1162 = vmatprep.subr.msk.bf16.mxu1 (!%p342_p6), %vm611_vm2, %v594_v48  ;;  %v613_v49 = vsel (!%p342_p6), %vm611_vm2, %v594_v48, 0  ;;  %v1085_v50 = vld [vmem:[%s1742_s4] ss:$0 sm:$0xff] (!%p342_p6) }
  0x10   : > { %1139 = vmatpush3.bf16.msra.mxu0 (!%p342_p6), %v1191_v13 }
  0x12   : > { %s1816_s26 = smov (!%p386_p7, %s1076_s26), 7  ;;  %s1120_s13 = sshll.u32 (%p1321_p4), %s1309_s20, 3 }
  0x13   : > { %s1077_s27 = sshll.u32 %s1816_s26, 3  ;;  %s375_s26 = sand.u32 1, %s1224_s17  }
  0x14   : > { %s389_s30 = scalar_lea.vmem %s1738_s0, %s1077_s27  ;;  %s1550_s12 = scalar_lea.vmem %s1749_s11, %s1077_s27 }
  0x15   : > { %v1334_v0 = vld [vmem:[%s389_s30 + $0x10] sm:$0xff]  ;;  %v1336_v1 = vld [vmem:[%s389_s30] sm:$0xff]  ;;  %v1338_v2 = vld [vmem:[%s389_s30 + $0x18] sm:$0xff]  ;;  %s1599_s17 = smul.u32 40, %s375_s26  ;;  %s943_s16 = scalar_lea.vmem (%p1321_p4), %s1748_s10, %s1120_s13 }
  0x16   : > { %v406_v3 = vmul.f32 %v1334_v0, %v1334_v0  ;;  %v404_v4 = vmul.f32 %v1336_v1, %v1336_v1  ;;  %v1344_v5 = vld [vmem:[%s389_s30 + $0x8] sm:$0xff]  ;;  %v407_v6 = vmul.f32 %v1338_v2, %v1338_v2 }
  0x17   : > { %v405_v7 = vmul.f32 %v1344_v5, %v1344_v5  ;;  %s1665_s27 = scalar_lea.vmem [#allocation2], %s1599_s17 }
  0x18   : > { %v415_v8 = vsel %vm1752_vm0, %v406_v3, 0.0  ;;  %v409_v9 = vsel %vm1752_vm0, %v404_v4, 0.0  ;;  %v418_v10 = vsel %vm1752_vm0, %v407_v6, 0.0  ;;  %v1193_v4 = vld [vmem:[%s1745_s7] sm:$0xff]  }
  0x19   : > { %416 = vadd.xlane.f32.xlu1 %v415_v8  ;;  %410 = vadd.xlane.f32.xlu0 %v409_v9  ;;  %v412_v11 = vsel %vm1752_vm0, %v405_v7, 0.0  ;;  %v1089_v6 = vld [vmem:[%s1744_s6] ss:$0 sm:$0xff] }
  0x1a   : > { %1156 = vmatprep.subr.bf16.mxu0 %v1193_v4 }
  0x1d   : > { %419 = vadd.xlane.f32.xlu1 %v418_v10  ;;  %413 = vadd.xlane.f32.xlu0 %v412_v11 }
  0xa6   : > { %v417_v14 = vpop.xlane.xlu1 %416  ;;  %v411_v15 = vpop.xlane.xlu0 %410 }
  0xa7   : > { %v423_v16 = vmax.f32 %v417_v14, 1e-24  ;;  %v421_v17 = vmax.f32 %v411_v15, 1e-24 }
  0xa9   : > { %1194 = vrsqrt.f32 %v423_v16 }
  0xaa   : > { %v420_v18 = vpop.xlane.xlu1 %419  ;;  %v414_v19 = vpop.xlane.xlu0 %413  ;;  %1196 = vrsqrt.f32 %v421_v17 }
  0xab   : > { %v424_v20 = vmax.f32 %v420_v18, 1e-24  ;;  %v422_v21 = vmax.f32 %v414_v19, 1e-24 }
  0xad   : > { %1198 = vrsqrt.f32 %v424_v20 }
  0xae   : > { %1200 = vrsqrt.f32 %v422_v21  ;;  %v1092_v21 = vld [vmem:[%s1746_s8] ss:$0 sm:$0xff] }
  0xb3   : > { %v1195_v22 = vpop.eup %1194 }
  0xb4   : > { %v1197_v23 = vpop.eup %1196  ;;  %v431_v26 = vmul.f32 %v1195_v22, %v1334_v0 }
  0xb5   : > { %v429_v28 = vmul.f32 %v1197_v23, %v1336_v1 }
  0xb7   : > { %v1199_v24 = vpop.eup %1198 }
  0xb8   : > { %v1201_v25 = vpop.eup %1200  ;;  %v432_v27 = vmul.f32 %v1199_v24, %v1338_v2 }
  0xb9   : > { %v430_v29 = vmul.f32 %v1201_v25, %v1344_v5  ;;  %v753_v25 = vlaneseq }
  0xba   : > { %v439_v30 = vpack.c.bf16 %v432_v27, %v431_v26 }
  0xbb   : > { %v438_v31 = vpack.c.bf16 %v430_v29, %v429_v28 }
  0xbd   : > { %1140 = vmatprep.mubr.msk.bf16.mxu0 %vm1752_vm0, %v438_v31  ;;  %v754_v31 = vshrl.u32 %v753_v25, 7 }
  0xbe   : > { %1141 = vmatmul.mubr.msk.bf16.vlgmr.msra.gmra.mrb[0].mxu0 %vm1752_vm0, %v439_v30 }
  0xbf   : > { %1157 = vmatpush3.bf16.msra.mxu0 %v1193_v4  ;;  %v755_v32 = vsub.s32 0, %v754_v31 }
 0x191   : > { %v1142_v34 = vpop.f32.mrb[0].mxu0 }
 0x192   : > { %v507_v35 = vadd.f32 %v1142_v34, %v1080_v33  ;;  %v498_v36 = vpop.f32.mrb[1].mxu0  ;;  %v763_v34 = vsub.s32 1, %v754_v31 }
 0x193   : > { %v499_v37 = vadd.f32 %v1080_v33, %v498_v36  ;;  %v1143_v38 = vpop.f32.mrb[2].mxu0 }
 0x194   : > { %v510_v39 = vadd.f32 %v1143_v38, %v1080_v33  ;;  %v501_v40 = vpop.f32.mrb[3].mxu0  ;;  %v515_v42 = vmax.f32 %v507_v35, 0.0 }
 0x195   : > { %v502_v41 = vadd.f32 %v1080_v33, %v501_v40  ;;  %v513_v44 = vmax.f32 %v499_v37, 0.0  ;;  %v752_v33 = vld [vmem:[%s1747_s9] sm:$0xf] }
 0x196   : > { %v516_v43 = vmax.f32 %v510_v39, 0.0  ;;  %v1394_v38 = vrot.slane %v752_v33, %v755_v32  ;;  %v771_v39 = vsub.s32 2, %v754_v31  ;;  %v1396_v40 = vrot.slane %v752_v33, %v763_v34 }
 0x197   : > { %v514_v45 = vmax.f32 %v502_v41, 0.0  ;;  %v779_v41 = vsub.s32 3, %v754_v31 }
 0x198   : > { %v521_v46 = vpack.c.bf16 %v516_v43, %v515_v42 }
 0x199   : > { %v520_v47 = vpack.c.bf16 %v514_v45, %v513_v44  ;;  %v1406_v48 = vrot.slane %v752_v33, %v779_v41 }
 0x19b   : > { %1146 = vmatprep.mubr.msk.bf16.mxu1 %vm534_vm1, %v520_v47 }
 0x19c   : > { %1147 = vmatmul.mubr.msk.bf16.vlgmr.msra.gmra.mrb[0].mxu1 %vm534_vm1, %v521_v46  ;;  %v1404_v46 = vrot.slane %v752_v33, %v771_v39 }
 0x19d   : > { %1151 = vmatpush3.bf16.msra.mxu1 %v613_v49 }
 0x26f   : > { %v1148_v51 = vpop.f32.mrb[0].mxu1 }
 0x270   : > { %v584_v52 = vadd.f32 %v1148_v51, %v1085_v50  ;;  %v575_v53 = vpop.f32.mrb[1].mxu1 }
 0x271   : > { %v576_v54 = vadd.f32 %v1085_v50, %v575_v53  ;;  %v1149_v55 = vpop.f32.mrb[2].mxu1 }
 0x272   : > { %v587_v56 = vadd.f32 %v1149_v55, %v1085_v50  ;;  %v578_v57 = vpop.f32.mrb[3].mxu1  ;;  %v592_v59 = vmax.f32 %v584_v52, 0.0  ;;  %v1234_v52 = vmov 0.0  }
 0x273   : > { %v579_v58 = vadd.f32 %v1085_v50, %v578_v57  ;;  %v590_v61 = vmax.f32 %v576_v54, 0.0  ;;  %v1764_v57 = vmov 0 }
 0x274   : > { %v593_v60 = vmax.f32 %v587_v56, 0.0 }
 0x275   : > { %v591_v62 = vmax.f32 %v579_v58, 0.0 }
 0x276   : > { %v597_v63 = vpack.c.bf16 %v593_v60, %v592_v59 }
 0x277   : > { %v596_v3 = vpack.c.bf16 %v591_v62, %v590_v61 }
 0x279   : > { %1152 = vmatprep.mubr.msk.bf16.mxu1 %vm604_vm3, %v596_v3  ;;  %v1766_v3 = vmov 0 }
 0x27a   : > { %1153 = vmatmul.mubr.msk.bf16.vlgmr.msra.gmra.mrb[4].mxu1 %vm604_vm3, %v597_v63 }
 0x34d   : > { %v1154_v7 = vpop.f32.mrb[4].mxu1 }
 0x34e   : > { %v658_v8 = vadd.f32 %v1154_v7, %v1089_v6  ;;  %v649_v9 = vpop.f32.mrb[5].mxu1 }
 0x34f   : > { %v650_v10 = vadd.f32 %v1089_v6, %v649_v9  ;;  %v1155_v11 = vpop.f32.mrb[6].mxu1 }
 0x350   : > { %v661_v12 = vadd.f32 %v1155_v11, %v1089_v6  ;;  %v652_v13 = vpop.f32.mrb[7].mxu1  ;;  %v666_v15 = vmax.f32 %v658_v8, 0.0  ;;  %v1768_v8 = vmov 0 }
 0x351   : > { %v653_v14 = vadd.f32 %v1089_v6, %v652_v13  ;;  %v664_v17 = vmax.f32 %v650_v10, 0.0 }
 0x352   : > { %v667_v16 = vmax.f32 %v661_v12, 0.0 }
 0x353   : > { %v665_v18 = vmax.f32 %v653_v14, 0.0 }
 0x354   : > { %v672_v19 = vpack.c.bf16 %v667_v16, %v666_v15 }
 0x355   : > { %v671_v20 = vpack.c.bf16 %v665_v18, %v664_v17 }
 0x357   : > { %1158 = vmatprep.mubr.msk.bf16.mxu0 %vm534_vm1, %v671_v20 }
 0x358   : > { %1159 = vmatmul.mubr.msk.bf16.vlgmr.msra.gmra.mrb[4].mxu0 %vm534_vm1, %v672_v19 }
 0x42b   : > { %v1160_v22 = vpop.f32.mrb[4].mxu0 }
 0x42c   : > { %v734_v23 = vadd.f32 %v1160_v22, %v1092_v21  ;;  %v725_v24 = vpop.f32.mrb[5].mxu0 }
 0x42d   : > { %v726_v26 = vadd.f32 %v1092_v21, %v725_v24  ;;  %v1161_v27 = vpop.f32.mrb[6].mxu0 }
 0x42e   : > { %1202 = vtanh.f32 %v734_v23  ;;  %v728_v28 = vpop.f32.mrb[7].mxu0  ;;  %v737_v29 = vadd.f32 %v1161_v27, %v1092_v21 }
 0x42f   : > { %1204 = vtanh.f32 %v726_v26  ;;  %v729_v30 = vadd.f32 %v1092_v21, %v728_v28 }
 0x430   : > { %1206 = vtanh.f32 %v737_v29 }
 0x431   : > { %1208 = vtanh.f32 %v729_v30 }
 0x438   : > { %v1203_v35 = vpop.eup %1202 }
 0x439   : > { %v1205_v36 = vpop.eup %1204  ;;  %v746_v37 = vmul.f32 2.5, %v1203_v35 }
 0x43a   : > { %v744_v42 = vmul.f32 2.5, %v1205_v36  ;;  %v1207_v45 = vpop.eup %1206 }
 0x43b   : > { %v1398_v43 = vadd.f32 2.5, %v746_v37  ;;  %v1209_v47 = vpop.eup %1208  ;;  %v747_v50 = vmul.f32 2.5, %v1207_v45 }
 0x43c   : > { %v1400_v44 = vadd.f32 2.5, %v744_v42  ;;  %v745_v51 = vmul.f32 2.5, %v1209_v47 }
 0x43d   : > { %vm759_vm4 = vcmp.gt.f32.partialorder %v1398_v43, %v1394_v38  ;;  %vm791_vm5 = vcmp.lt.f32.partialorder %v1398_v43, %v1396_v40  ;;  %vm767_vm9 = vcmp.gt.f32.partialorder %v1398_v43, %v1396_v40  ;;  %vm775_vm1 = vcmp.gt.f32.partialorder %v1398_v43, %v1404_v46 }
 0x43e   : > { %vm1410_vm6 = vmand %vm759_vm4, %vm791_vm5  ;;  %vm757_vm7 = vcmp.gt.f32.partialorder %v1400_v44, %v1394_v38  ;;  %vm765_vm8 = vcmp.gt.f32.partialorder %v1400_v44, %v1396_v40  ;;  %vm773_vm10 = vcmp.gt.f32.partialorder %v1400_v44, %v1404_v46  ;;  %vm789_vm11 = vcmp.lt.f32.partialorder %v1400_v44, %v1396_v40 }
 0x43f   : > { %v1103_v53 = vsel %vm1410_vm6, 1.0, %v1234_v52  ;;  %vm1751_vm12 = vcmp.lt.f32.partialorder %v1400_v44, %v1394_v38  ;;  %vm793_vm13 = vcmp.lt.f32.partialorder %v1400_v44, %v1404_v46  ;;  %vm797_vm14 = vcmp.lt.f32.partialorder %v1400_v44, %v1406_v48  ;;  %vm1433_vm15 = vmand %vm757_vm7, %vm789_vm11 }
 0x440   : > { %vm795_vm2 = vcmp.lt.f32.partialorder %v1398_v43, %v1404_v46  ;;  %vm1750_vm3 = vcmp.gt.f32.partialorder %v1400_v44, %v1406_v48  ;;  %vm1446_vm4 = vmand %vm765_vm8, %vm793_vm13  ;;  %v1101_v56 = vsel %vm1433_vm15, 1.0, %v1234_v52  ;;  %vm799_vm5 = vcmp.lt.f32.partialorder %v1398_v43, %v1406_v48 }
 0x441   : > { %vm1458_vm7 = vmand %vm773_vm10, %vm797_vm14  ;;  %v844_v58 = vmul.f32 2.0, %v1101_v56  ;;  %v1106_v59 = vsel %vm1446_vm4, 1.0, %v1234_v52  ;;  %v1465_v60 = vadd.f32 2.5, %v747_v50  ;;  %vm787_vm8 = vcmp.lt.f32.partialorder %v1398_v43, %v1394_v38 }
 0x442   : > { %v1765_v57 = vsel %vm1458_vm7, 4294967295, %v1764_v57  ;;  %v846_v61 = vmul.f32 2.0, %v1103_v53  ;;  %v1096_v62 = vsel %vm1751_vm12, 1.0, %v1234_v52  ;;  %v1111_v63 = vsel %vm1458_vm7, 1.0, %v1234_v52  ;;  %vm1479_vm10 = vmand %vm767_vm9, %vm795_vm2 }
 0x443   : > { %v1767_v3 = vsel %vm1479_vm10, 4294967295, %v1766_v3  ;;  %v848_v4 = vadd.f32 %v1096_v62, %v844_v58  ;;  %v866_v6 = vmul.f32 3.0, %v1106_v59  ;;  %v1116_v7 = vsel %vm1750_vm3, 1.0, %v1234_v52  ;;  %vm1492_vm13 = vmand %vm775_vm1, %vm799_vm5 }
 0x444   : > { %vm760_vm11 = vcmp.gt.f32.partialorder %v1465_v60, %v1394_v38  ;;  %v1769_v8 = vsel %vm1492_vm13, 4294967295, %v1768_v8  ;;  %v888_v9 = vmul.f32 4.0, %v1111_v63  ;;  %vm768_vm9 = vcmp.gt.f32.partialorder %v1465_v60, %v1396_v40 }
 0x445   : > { %vm1753_vm2 = vcmp.lt.f32.partialorder %v1465_v60, %v1394_v38  ;;  %v870_v10 = vadd.f32 %v866_v6, %v848_v4  ;;  %vm792_vm3 = vcmp.lt.f32.partialorder %v1465_v60, %v1396_v40  ;;  %vm796_vm1 = vcmp.lt.f32.partialorder %v1465_v60, %v1404_v46 }
 0x446   : > { %vm800_vm5 = vcmp.lt.f32.partialorder %v1465_v60, %v1406_v48  ;;  %vm1514_vm12 = vmpackc.low %vm1753_vm2, %vm787_vm8  ;;  %v1522_v13 = vadd.f32 2.5, %v745_v51  ;;  %v910_v15 = vmul.f32 5.0, %v1116_v7  ;;  %vm918_vm2 = vcmp.gt.f32.partialorder %v1336_v1, 0.0 }
 0x447   : > { %vm1518_vm0 = vmand %vm760_vm11, %vm792_vm3  ;;  %v892_v14 = vadd.f32 %v888_v9, %v870_v10  ;;  %v1098_v18 = vsel %vm787_vm8, 1.0, %v1234_v52  ;;  %vm1776_vm11 = vcmp.gt.f32.partialorder %v1465_v60, %v1404_v46  ;;  %v1108_v22 = vsel %vm1479_vm10, 1.0, %v1234_v52 }
 0x448   : > { %vm1524_vm14 = vmand %vm768_vm9, %vm796_vm1  ;;  %v1104_v17 = vsel %vm1518_vm0, 1.0, %v1234_v52  ;;  %v850_v21 = vadd.f32 %v1098_v18, %v846_v61  ;;  %vm794_vm3 = vcmp.lt.f32.partialorder %v1522_v13, %v1404_v46  ;;  %v868_v28 = vmul.f32 3.0, %v1108_v22 }
 0x449   : > { %vm1541_vm9 = vmand %vm1776_vm11, %vm800_vm5  ;;  %v847_v20 = vmul.f32 2.0, %v1104_v17  ;;  %v914_v23 = vadd.f32 %v910_v15, %v892_v14  ;;  %vm1779_vm5 = vcmp.lt.f32.partialorder %v1465_v60, %v1394_v38  ;;  %v1109_v25 = vsel %vm1524_vm14, 1.0, %v1234_v52 }
 0x44a   : > { %v1099_v24 = vsel %vm1779_vm5, 1.0, %v1234_v52  ;;  %vm790_vm11 = vcmp.lt.f32.partialorder %v1522_v13, %v1396_v40  ;;  %vm1780_vm8 = vcmask 261120   ;;  %vm1781_vm1 = vcmp.gt.f32.partialorder %v1398_v43, %v1406_v48 }
 0x44b   : > { %v922_v26 = vsel %vm918_vm2, %v914_v23, 0.0  ;;  %v851_v27 = vadd.f32 %v1099_v24, %v847_v20  ;;  %vm1782_vm2 = vcmp.gt.f32.partialorder %v1465_v60, %v1406_v48  ;;  %v1783_v1 = vmov 0 }
 0x44c   : > { %926 = vst.msk [vmem:[%s1550_s12] sm:$0xff] %vm1780_vm8, %v922_v26  ;;  %vm1595_vm7 = vmpackc.low %vm1782_vm2, %vm1781_vm1  ;;  %vm774_vm5 = vcmp.gt.f32.partialorder %v1522_v13, %v1404_v46  ;;  %vm798_vm10 = vcmp.lt.f32.partialorder %v1522_v13, %v1406_v48  ;;  %v1113_v29 = vsel %vm1492_vm13, 1.0, %v1234_v52  ;;  %v869_v30 = vmul.f32 3.0, %v1109_v25 }
 0x44d   : > { %v1784_v1 = vsel %vm1595_vm7, 4294967295, %v1783_v1  ;;  %vm786_vm8 = vcmp.lt.f32.partialorder %v1522_v13, %v1394_v38  ;;  %vm1785_vm1 = vcmp.gt.f32.partialorder %v1522_v13, %v1394_v38  ;;  %v872_v32 = vadd.f32 %v868_v28, %v850_v21 }
 0x44e   : > { %vm1613_vm2 = vmand %vm1785_vm1, %vm790_vm11  ;;  %v1114_v33 = vsel %vm1541_vm9, 1.0, %v1234_v52  ;;  %vm1788_vm7 = vcmp.gt.f32.partialorder %v1522_v13, %v1396_v40  ;;  %v873_v36 = vadd.f32 %v869_v30, %v851_v27  ;;  %vm782_vm11 = vcmp.gt.f32.partialorder %v1522_v13, %v1406_v48 }
 0x44f   : > { %vm1623_vm13 = vmand %vm1788_vm7, %vm794_vm3  ;;  %v1102_v35 = vsel %vm1613_vm2, 1.0, %v1234_v52  ;;  %v890_v41 = vmul.f32 4.0, %v1113_v29  ;;  %vm1793_vm7 = vcmp.lt.f32.partialorder %v1400_v44, %v1394_v38  ;;  %v1097_v42 = vsel %vm786_vm8, 1.0, %v1234_v52 }
 0x450   : > { %vm1632_vm1 = vmand %vm774_vm5, %vm798_vm10  ;;  %v845_v39 = vmul.f32 2.0, %v1102_v35  ;;  %v1107_v40 = vsel %vm1623_vm13, 1.0, %v1234_v52  ;;  %vm1794_vm10 = vcmp.gt.f32.partialorder %v1398_v43, %v1406_v48  ;;  %v891_v47 = vmul.f32 4.0, %v1114_v33 }
 0x451   : > { %vm813_vm3 = vmpackc.low %vm786_vm8, %vm1793_vm7  ;;  %v1112_v45 = vsel %vm1632_vm1, 1.0, %v1234_v52  ;;  %v1118_v46 = vsel %vm1794_vm10, 1.0, %v1234_v52  ;;  %v867_v51 = vmul.f32 3.0, %v1107_v40  ;;  %v894_v38 = vadd.f32 %v890_v41, %v872_v32 }
 0x452   : > { %vm815_vm5 = vmpackc.even %vm1514_vm12, %vm813_vm3  ;;  %v849_v50 = vadd.f32 %v1097_v42, %v845_v39  ;;  %vm1795_vm8 = vcmp.gt.f32.partialorder %v1465_v60, %v1406_v48  ;;  %v1235_v56 = vmov 0   ;;  %v1117_v43 = vsel %vm782_vm11, 1.0, %v1234_v52 }
 0x453   : > { %v1119_v53 = vsel %vm1795_vm8, 1.0, %v1234_v52  ;;  %v816_v58 = vsel %vm815_vm5, 16843009, %v1235_v56  ;;  %vm830_vm7 = vmpackc.low %vm1613_vm2, %vm1433_vm15  ;;  %v895_v59 = vadd.f32 %v891_v47, %v873_v36  ;;  %vm1796_vm12 = vcmask 261120  }
 0x454   : > { %817 = vst.msk [vmem:[%s1665_s27] sm:$0xff] %vm1796_vm12, %v816_v58  ;;  %vm1797_vm3 = vmpackc.low %vm1518_vm0, %vm1410_vm6  ;;  %v871_v54 = vadd.f32 %v867_v51, %v849_v50  ;;  %v889_v60 = vmul.f32 4.0, %v1112_v45  ;;  %v912_v61 = vmul.f32 5.0, %v1118_v46  ;;  %v913_v52 = vmul.f32 5.0, %v1119_v53 }
 0x455   : > { %vm832_vm10 = vmpackc.even %vm1797_vm3, %vm830_vm7  ;;  %vm1799_vm5 = vnez %v1767_v3  ;;  %v911_v63 = vmul.f32 5.0, %v1117_v43  ;;  %vm919_vm6 = vcmp.gt.f32.partialorder %v1344_v5, 0.0  ;;  %vm1801_vm7 = vnez %v1765_v57 }
 0x456   : > { %v833_v62 = vsel %vm832_vm10, 16843009, %v1235_v56  ;;  %vm852_vm15 = vmpackc.low %vm1623_vm13, %vm1446_vm4  ;;  %v893_v49 = vadd.f32 %v889_v60, %v871_v54  ;;  %v916_v4 = vadd.f32 %v912_v61, %v894_v38  ;;  %vm920_vm13 = vcmp.gt.f32.partialorder %v1334_v0, 0.0 }
 0x457   : > { %vm1798_vm2 = vmmov %vm1796_vm12  ;;  %v917_v3 = vadd.f32 %v913_v52, %v895_v59  ;;  %vm1803_vm12 = vnez %v1769_v8 }
 0x458   : > { %1100 = vst.msk [vmem:[%s1665_s27 + $0x8] sm:$0xff] %vm1798_vm2, %v833_v62  ;;  %vm1800_vm8 = vmpackc.low %vm1524_vm14, %vm1799_vm5  ;;  %v915_v5 = vadd.f32 %v911_v63, %v893_v49  ;;  %v924_v6 = vsel %vm920_vm13, %v916_v4, 0.0 }
 0x459   : > { %vm854_vm0 = vmpackc.even %vm1800_vm8, %vm852_vm15  ;;  %vm921_vm15 = vcmp.gt.f32.partialorder %v1338_v2, 0.0  ;;  %vm1807_vm8 = vnez %v1784_v1 }
 0x45a   : > { %v855_v55 = vsel %vm854_vm0, 16843009, %v1235_v56  ;;  %vm874_vm4 = vmpackc.low %vm1632_vm1, %vm1801_vm7  ;;  %vm1805_vm1 = vcmp.gt.f32.partialorder %v1400_v44, %v1406_v48  ;;  %v923_v0 = vsel %vm919_vm6, %v915_v5, 0.0  ;;  %v925_v8 = vsel %vm921_vm15, %v917_v3, 0.0 }
 0x45b   : > { %vm1802_vm14 = vmmov %vm1798_vm2  ;;  %v979_v2 = vld [vmem:[%s1665_s27] sm:$0xff] (%p1321_p4) }
 0x45c   : > { %1105 = vst.msk [vmem:[%s1665_s27 + $0x10] sm:$0xff] %vm1802_vm14, %v855_v55  ;;  %vm1804_vm3 = vmpackc.low %vm1541_vm9, %vm1803_vm12 }
 0x45d   : > { %vm876_vm10 = vmpackc.even %vm1804_vm3, %vm874_vm4  ;;  %980 = vst [vmem:[%s943_s16] sm:$0xff] (%p1321_p4), %v979_v2 }
 0x45e   : > { %v877_v57 = vsel %vm876_vm10, 16843009, %v1235_v56  ;;  %vm896_vm2 = vmpackc.low %vm782_vm11, %vm1805_vm1 }
 0x45f   : > { %vm1806_vm5 = vmmov %vm1802_vm14  ;;  %941 = sbr.rel (!%p1321_p4) target bundleno = 1132 (0x46c), region = 64  ;;  %v981_v44 = vld [vmem:[%s1665_s27 + $0x8] sm:$0xff] (%p1321_p4) }
 0x460   : > { %1110 = vst.msk [vmem:[%s1665_s27 + $0x18] sm:$0xff] %vm1806_vm5, %v877_v57  ;;  %vm898_vm0 = vmpackc.even %vm1807_vm8, %vm896_vm2 }
 0x461   : > { %v899_v7 = vsel %vm898_vm0, 16843009, %v1235_v56  ;;  %vm1808_vm9 = vmmov %vm1806_vm5  ;;  %982 = vst [vmem:[%s943_s16 + $0x10] sm:$0xff] (%p1321_p4), %v981_v44 }
 0x462   : > { %927 = vst.msk [vmem:[%s1550_s12 + $0x8] sm:$0xff] %vm1808_vm9, %v923_v0  ;;  %vm1809_vm7 = vmmov %vm1806_vm5 }
 0x463   : > { %1115 = vst.msk [vmem:[%s1665_s27 + $0x20] sm:$0xff] %vm1809_vm7, %v899_v7  ;;  %vm1810_vm4 = vmmov %vm1806_vm5  ;;  %v983_v48 = vld [vmem:[%s1665_s27 + $0x10] sm:$0xff] (%p1321_p4) }
 0x464   : > { %928 = vst.msk [vmem:[%s1550_s12 + $0x10] sm:$0xff] %vm1810_vm4, %v924_v6  ;;  %vm1811_vm14 = vmmov %vm1810_vm4 }
 0x465   : > { %929 = vst.msk [vmem:[%s1550_s12 + $0x18] sm:$0xff] %vm1811_vm14, %v925_v8  ;;  %984 = vst [vmem:[%s943_s16 + $0x20] sm:$0xff] (%p1321_p4), %v983_v48 }
 0x467   : > { %v985_v9 = vld [vmem:[%s1665_s27 + $0x18] sm:$0xff] }
 0x468   : > { %986 = vst [vmem:[%s943_s16 + $0x30] sm:$0xff] %v985_v9 }
 0x46a   : > { %v987_v10 = vld [vmem:[%s1665_s27 + $0x20] sm:$0xff] }
 0x46b   : > { %988 = vst [vmem:[%s943_s16 + $0x40] sm:$0xff] %v987_v10 }
 0x46c PF: > { %p19_p8 = scmp.ge.s32.totalorder %s1311_s21, 4   ;;  %s1812_s17 = smov %s1228_s18 }
 0x46d   : > { %s1813_s18 = smov %s1319_s24  ;;  %s1814_s19 = smov %s1311_s21 }
 0x46e   :  { %21 = sbr.rel (!%p19_p8) target bundleno = 2 (0x2), region = 144 }

</bundles_post_ra>
